<compile_context>
chip_gen: v7x
topology: tpu7x:2x2x1
jax: 0.10.0
libtpu: 0.0.40
codegen_flags: <defaults>
</compile_context>

<pallas_src>
import functools

import jax
import jax.numpy as jnp
from jax.experimental import pallas as pl
from jax.experimental.pallas import tpu as pltpu


def _self_attention_kernel(x_ref, wqkv_ref, wu_ref, bias_ref, mask_ref, o_ref,
                           *, heads, emb, seq, bblk):
    """One grid step handles a (Bblk, T, E) slab of batch elements; all heads inside."""
    he = heads * emb
    m = bblk * seq

    # Fused, lane-dense QKV projection: (Bblk*T, E) @ (E, 3*H*E), bf16 operands / f32 acc.
    x2 = x_ref[...].reshape(m, emb).astype(jnp.bfloat16)
    qkv = jnp.dot(x2, wqkv_ref[...], preferred_element_type=jnp.float32)   # (M, 3*H*E) f32

    keep = mask_ref[...] != 0            # (Bblk, 1, T) bool; broadcasts over query rows

    acc = jnp.zeros((m, emb), jnp.float32)   # f32 unifyheads accumulator (no lane-axis concat)

    for hi in range(heads):              # static unroll over heads (H small)
        lo = hi * emb
        # Per-head q/k/v (softmax scale already folded into Wq wrapper-side).
        q = qkv[:, lo:lo + emb].reshape(bblk, seq, emb).astype(jnp.bfloat16)
        k = qkv[:, he + lo:he + lo + emb].reshape(bblk, seq, emb).astype(jnp.bfloat16)
        v = qkv[:, 2 * he + lo:2 * he + lo + emb].reshape(bblk, seq, emb).astype(jnp.bfloat16)

        # Scores batched over the Bblk batch dim (no K transpose materialized).
        s = jnp.einsum('bqe,bke->bqk', q, k,
                       preferred_element_type=jnp.float32)                # (Bblk, T, T) f32

        # Key-side padding mask in f32 (matches masked_fill(mask == 0, -1e9)).
        s = jnp.where(keep, s, -1.0e9)

        # Softmax over keys, kept in f32.
        s = s - jnp.max(s, axis=-1, keepdims=True)
        p = jnp.exp(s)
        p = p * pl.reciprocal(jnp.sum(p, axis=-1, keepdims=True), approx=True)

        o_h = jnp.einsum('bqk,bke->bqe', p.astype(jnp.bfloat16), v,
                         preferred_element_type=jnp.float32)              # (Bblk, T, E) f32

        # Per-head unifyheads contribution; Wu row slice is a sublane-aligned ref view.
        wu_h = wu_ref[pl.ds(lo, emb), :]                                  # (E, E) bf16
        acc = acc + jnp.dot(o_h.reshape(m, emb).astype(jnp.bfloat16), wu_h,
                            preferred_element_type=jnp.float32)

    out = acc + bias_ref[...]                                             # (M, E) + (1, E)
    o_ref[...] = out.reshape(bblk, seq, emb).astype(o_ref.dtype)


def self_attention_pallas(x, wq_t, wk_t, wv_t, wu_t, bias, mask, heads, batch_block=None):
    """x: (B,T,E); w*_t: (E, H*E) transposed torch Linear weights; wu_t: (H*E, E);
    bias: (E,); mask: (B,T) (nonzero = attend)."""
    b, t, e = x.shape
    h = heads
    he = h * e

    if batch_block is None:
        # Largest divisor of B up to 8 batch elements per grid step.
        batch_block = next(c for c in range(min(b, 8), 0, -1) if b % c == 0)
    assert b % batch_block == 0, "batch_block must divide batch"

    # One-time weight prep (plain JAX glue, outside the kernel):
    #  - fold 1/sqrt(E) into Wq (identical to e**-0.25 on both q and k),
    #  - fuse Q/K/V into a single lane-dense weight,
    #  - cast matmul weights to bf16 (MXU-native on v5e/v6e/v7x); bias stays f32.
    inv_sqrt_e = 1.0 / (float(e) ** 0.5)
    wqkv = jnp.concatenate([wq_t * inv_sqrt_e, wk_t, wv_t], axis=-1).astype(jnp.bfloat16)
    wu_b = wu_t.astype(jnp.bfloat16)
    bias2 = bias.reshape(1, e).astype(jnp.float32)
    mask3 = mask.reshape(b, 1, t).astype(jnp.int32)      # integer mask, compared != 0

    kernel = functools.partial(_self_attention_kernel,
                               heads=h, emb=e, seq=t, bblk=batch_block)

    # Advisory cost estimate so XLA schedules around the custom call.
    flops = (2 * b * t * e * 3 * he          # fused QKV projection
             + 4 * b * h * t * t * e         # scores + P@V
             + 2 * b * t * he * e)           # unifyheads
    bytes_accessed = (x.size * 4 + wqkv.size * 2 + wu_b.size * 2
                      + bias2.size * 4 + mask3.size * 4 + b * t * e * 4)
    cost = pl.CostEstimate(flops=flops, transcendentals=b * h * t * t,
                           bytes_accessed=bytes_accessed)

    return pl.pallas_call(
        kernel,
        out_shape=jax.ShapeDtypeStruct((b, t, e), jnp.float32),
        grid_spec=pltpu.PrefetchScalarGridSpec(
            num_scalar_prefetch=0,
            grid=(b // batch_block,),
            in_specs=[
                pl.BlockSpec((batch_block, t, e), lambda i: (i, 0, 0)),   # x slab
                pl.BlockSpec((e, 3 * he), lambda i: (0, 0)),              # fused Wqkv (resident)
                pl.BlockSpec((he, e), lambda i: (0, 0)),                  # Wu (resident)
                pl.BlockSpec((1, e), lambda i: (0, 0)),                   # bias (resident)
                pl.BlockSpec((batch_block, 1, t), lambda i: (i, 0, 0)),   # key-side mask
            ],
            out_specs=pl.BlockSpec((batch_block, t, e), lambda i: (i, 0, 0)),
        ),
        compiler_params=pltpu.CompilerParams(
            dimension_semantics=("parallel",)),
        cost_estimate=cost,
    )(x, wqkv, wu_b, bias2, mask3)


def self_attention_reference(x, wq_t, wk_t, wv_t, wu_t, bias, mask, heads):
    """Plain-JAX transcription of the PyTorch forward (for verification)."""
    b, t, e = x.shape
    h = heads
    scale = float(e) ** 0.25

    def proj(w):
        return (x @ w).reshape(b, t, h, e).transpose(0, 2, 1, 3)  # (B,H,T,E)

    q = proj(wq_t) / scale
    k = proj(wk_t) / scale
    v = proj(wv_t)
    dot = jnp.einsum('bhqe,bhke->bhqk', q, k)
    dot = jnp.where(mask[:, None, None, :] == 0, -1.0e9, dot)
    p = jax.nn.softmax(dot, axis=-1)
    out = jnp.einsum('bhqk,bhke->bhqe', p, v)
    out = out.transpose(0, 2, 1, 3).reshape(b, t, h * e)
    return out @ wu_t + bias


if __name__ == "__main__":
    B, T, E, H = 2, 8, 16, 4

    key = jax.random.PRNGKey(0)
    kx, kq, kk, kv, ku, kb, km = jax.random.split(key, 7)

    x = jax.random.normal(kx, (B, T, E), dtype=jnp.float32)

    # torch nn.Linear(emb, emb*heads, bias=False): weight (out,in); we store W.T.
    wq_t = jax.random.normal(kq, (E, H * E), dtype=jnp.float32) * 0.05
    wk_t = jax.random.normal(kk, (E, H * E), dtype=jnp.float32) * 0.05
    wv_t = jax.random.normal(kv, (E, H * E), dtype=jnp.float32) * 0.05
    # torch nn.Linear(heads*emb, emb): weight (emb, heads*emb); store W.T and bias.
    wu_t = jax.random.normal(ku, (H * E, E), dtype=jnp.float32) * 0.05
    bias = jax.random.normal(kb, (E,), dtype=jnp.float32) * 0.05

    # Padding mask (B, T): 1 = valid token, 0 = masked out (forced at least col 0 valid).
    mask = (jax.random.uniform(km, (B, T)) > 0.3).astype(jnp.float32)
    mask = mask.at[:, 0].set(1.0)

    out = self_attention_pallas(x, wq_t, wk_t, wv_t, wu_t, bias, mask, H)
    out = jax.block_until_ready(out)

    ref = self_attention_reference(x, wq_t, wk_t, wv_t, wu_t, bias, mask, H)
    assert out.shape == (B, T, E)
    # Tolerance reflects bf16 MXU operands (f32 accumulation) plus the EUP approximate
    # reciprocal in the softmax denominator; softmax/mask math itself is kept in f32.
    assert jnp.allclose(out, ref, atol=2e-2, rtol=2e-2), "mismatch vs reference"

    print("KERNEL_OK")
</pallas_src>

<mosaic_0001>
module attributes {stable_mosaic.version = 11 : i64} {
  func.func @_self_attention_kernel(%arg0: i32, %arg1: memref<2x8x16xf32, #tpu.memory_space<vmem>>, %arg2: memref<16x192xbf16, #tpu.memory_space<vmem>>, %arg3: memref<64x16xbf16, #tpu.memory_space<vmem>>, %arg4: memref<1x16xf32, #tpu.memory_space<vmem>>, %arg5: memref<2x1x8xi32, #tpu.memory_space<vmem>>, %arg6: memref<2x8x16xf32, #tpu.memory_space<vmem>>) attributes {dimension_semantics = [#tpu.dimension_semantics<parallel>], iteration_bounds = array<i64: 1>, scalar_prefetch = 0 : i64, scratch_operands = 0 : i64, tpu.core_type = #tpu.core_type<tc>, window_params = [{transform_indices = @transform_0, window_bounds = array<i64: 2, 8, 16>}, {pipeline_mode = #tpu.pipeline_mode<synchronous>, transform_indices = @transform_1, window_bounds = array<i64: 16, 192>}, {pipeline_mode = #tpu.pipeline_mode<synchronous>, transform_indices = @transform_2, window_bounds = array<i64: 64, 16>}, {pipeline_mode = #tpu.pipeline_mode<synchronous>, transform_indices = @transform_3, window_bounds = array<i64: 1, 16>}, {transform_indices = @transform_4, window_bounds = array<i64: 2, 1, 8>}, {transform_indices = @transform_5, window_bounds = array<i64: 2, 8, 16>}]} {
    %c0 = arith.constant 0 : index
    %c0_0 = arith.constant 0 : index
    %c0_1 = arith.constant 0 : index
    %0 = vector.load %arg1[%c0, %c0_0, %c0_1] : memref<2x8x16xf32, #tpu.memory_space<vmem>>, vector<2x8x16xf32>
    %1 = vector.shape_cast %0 : vector<2x8x16xf32> to vector<16x16xf32>
    %2 = arith.truncf %1 : vector<16x16xf32> to vector<16x16xbf16>
    %c0_2 = arith.constant 0 : index
    %c0_3 = arith.constant 0 : index
    %3 = vector.load %arg2[%c0_2, %c0_3] : memref<16x192xbf16, #tpu.memory_space<vmem>>, vector<16x192xbf16>
    %cst = arith.constant dense<0.000000e+00> : vector<16x192xf32>
    %4 = tpu.matmul %2, %3, %cst {dimension_numbers = #tpu.dot_dimension_numbers<[1], [0], [0], [1], [0, 0, 1, 1], [], []>} : vector<16x16xbf16>, vector<16x192xbf16>, vector<16x192xf32> -> vector<16x192xf32>
    %c0_4 = arith.constant 0 : index
    %c0_5 = arith.constant 0 : index
    %c0_6 = arith.constant 0 : index
    %5 = vector.load %arg5[%c0_4, %c0_5, %c0_6] : memref<2x1x8xi32, #tpu.memory_space<vmem>>, vector<2x1x8xi32>
    %c0_i32 = arith.constant 0 : i32
    %6 = vector.broadcast %c0_i32 : i32 to vector<2x1x8xi32>
    %7 = arith.cmpi ne, %5, %6 : vector<2x1x8xi32>
    %cst_7 = arith.constant 0.000000e+00 : f32
    %8 = vector.broadcast %cst_7 : f32 to vector<16x16xf32>
    %9 = vector.extract_strided_slice %4 {offsets = [0, 0], sizes = [16, 16], strides = [1, 1]} : vector<16x192xf32> to vector<16x16xf32>
    %10 = vector.shape_cast %9 : vector<16x16xf32> to vector<2x8x16xf32>
    %11 = arith.truncf %10 : vector<2x8x16xf32> to vector<2x8x16xbf16>
    %12 = vector.extract_strided_slice %4 {offsets = [0, 64], sizes = [16, 16], strides = [1, 1]} : vector<16x192xf32> to vector<16x16xf32>
    %13 = vector.shape_cast %12 : vector<16x16xf32> to vector<2x8x16xf32>
    %14 = arith.truncf %13 : vector<2x8x16xf32> to vector<2x8x16xbf16>
    %15 = vector.extract_strided_slice %4 {offsets = [0, 128], sizes = [16, 16], strides = [1, 1]} : vector<16x192xf32> to vector<16x16xf32>
    %16 = vector.shape_cast %15 : vector<16x16xf32> to vector<2x8x16xf32>
    %17 = arith.truncf %16 : vector<2x8x16xf32> to vector<2x8x16xbf16>
    "tpu.trace_start"() <{level = 10 : i32, message = "bqe,bke->bqk"}> : () -> ()
    %cst_8 = arith.constant dense<0.000000e+00> : vector<2x8x8xf32>
    %18 = tpu.matmul %11, %14, %cst_8 {dimension_numbers = #tpu.dot_dimension_numbers<[2], [2], [1], [1], [0, 0, 0, 1, 1, 1], [0], [0]>} : vector<2x8x16xbf16>, vector<2x8x16xbf16>, vector<2x8x8xf32> -> vector<2x8x8xf32>
    %cst_9 = arith.constant -1.000000e+09 : f32
    "tpu.trace_stop"() : () -> ()
    %19 = vector.shape_cast %7 : vector<2x1x8xi1> to vector<2x1x8xi1>
    %20 = vector.broadcast %19 : vector<2x1x8xi1> to vector<2x8x8xi1>
    %21 = vector.broadcast %cst_9 : f32 to vector<2x8x8xf32>
    %22 = arith.select %20, %18, %21 : vector<2x8x8xi1>, vector<2x8x8xf32>
    %cst_10 = arith.constant dense<0xFF800000> : vector<2x8xf32>
    %23 = vector.multi_reduction <maximumf>, %22, %cst_10 [2] : vector<2x8x8xf32> to vector<2x8xf32>
    %24 = vector.shape_cast %23 : vector<2x8xf32> to vector<2x8x1xf32>
    %25 = vector.broadcast %24 : vector<2x8x1xf32> to vector<2x8x8xf32>
    %26 = arith.subf %22, %25 : vector<2x8x8xf32>
    %27 = math.exp %26 : vector<2x8x8xf32>
    %cst_11 = arith.constant dense<0.000000e+00> : vector<2x8xf32>
    %28 = vector.multi_reduction <add>, %27, %cst_11 [2] : vector<2x8x8xf32> to vector<2x8xf32>
    %29 = vector.shape_cast %28 : vector<2x8xf32> to vector<2x8x1xf32>
    %30 = tpu.reciprocal %29 {approx = true} : vector<2x8x1xf32> -> vector<2x8x1xf32>
    %31 = vector.broadcast %30 : vector<2x8x1xf32> to vector<2x8x8xf32>
    %32 = arith.mulf %27, %31 : vector<2x8x8xf32>
    %33 = arith.truncf %32 : vector<2x8x8xf32> to vector<2x8x8xbf16>
    "tpu.trace_start"() <{level = 10 : i32, message = "bqk,bke->bqe"}> : () -> ()
    %cst_12 = arith.constant dense<0.000000e+00> : vector<2x8x16xf32>
    %34 = tpu.matmul %33, %17, %cst_12 {dimension_numbers = #tpu.dot_dimension_numbers<[2], [1], [1], [2], [0, 0, 0, 1, 1, 2], [0], [0]>} : vector<2x8x8xbf16>, vector<2x8x16xbf16>, vector<2x8x16xf32> -> vector<2x8x16xf32>
    "tpu.trace_stop"() : () -> ()
    %c0_13 = arith.constant 0 : index
    %c0_14 = arith.constant 0 : index
    %35 = vector.load %arg3[%c0_13, %c0_14] : memref<64x16xbf16, #tpu.memory_space<vmem>>, vector<16x16xbf16>
    %36 = vector.shape_cast %34 : vector<2x8x16xf32> to vector<16x16xf32>
    %37 = arith.truncf %36 : vector<16x16xf32> to vector<16x16xbf16>
    %cst_15 = arith.constant dense<0.000000e+00> : vector<16x16xf32>
    %38 = tpu.matmul %37, %35, %cst_15 {dimension_numbers = #tpu.dot_dimension_numbers<[1], [0], [0], [1], [0, 0, 1, 1], [], []>} : vector<16x16xbf16>, vector<16x16xbf16>, vector<16x16xf32> -> vector<16x16xf32>
    %39 = arith.addf %8, %38 : vector<16x16xf32>
    %40 = vector.extract_strided_slice %4 {offsets = [0, 16], sizes = [16, 16], strides = [1, 1]} : vector<16x192xf32> to vector<16x16xf32>
    %41 = vector.shape_cast %40 : vector<16x16xf32> to vector<2x8x16xf32>
    %42 = arith.truncf %41 : vector<2x8x16xf32> to vector<2x8x16xbf16>
    %43 = vector.extract_strided_slice %4 {offsets = [0, 80], sizes = [16, 16], strides = [1, 1]} : vector<16x192xf32> to vector<16x16xf32>
    %44 = vector.shape_cast %43 : vector<16x16xf32> to vector<2x8x16xf32>
    %45 = arith.truncf %44 : vector<2x8x16xf32> to vector<2x8x16xbf16>
    %46 = vector.extract_strided_slice %4 {offsets = [0, 144], sizes = [16, 16], strides = [1, 1]} : vector<16x192xf32> to vector<16x16xf32>
    %47 = vector.shape_cast %46 : vector<16x16xf32> to vector<2x8x16xf32>
    %48 = arith.truncf %47 : vector<2x8x16xf32> to vector<2x8x16xbf16>
    "tpu.trace_start"() <{level = 10 : i32, message = "bqe,bke->bqk"}> : () -> ()
    %cst_16 = arith.constant dense<0.000000e+00> : vector<2x8x8xf32>
    %49 = tpu.matmul %42, %45, %cst_16 {dimension_numbers = #tpu.dot_dimension_numbers<[2], [2], [1], [1], [0, 0, 0, 1, 1, 1], [0], [0]>} : vector<2x8x16xbf16>, vector<2x8x16xbf16>, vector<2x8x8xf32> -> vector<2x8x8xf32>
    %cst_17 = arith.constant -1.000000e+09 : f32
    "tpu.trace_stop"() : () -> ()
    %50 = vector.shape_cast %7 : vector<2x1x8xi1> to vector<2x1x8xi1>
    %51 = vector.broadcast %50 : vector<2x1x8xi1> to vector<2x8x8xi1>
    %52 = vector.broadcast %cst_17 : f32 to vector<2x8x8xf32>
    %53 = arith.select %51, %49, %52 : vector<2x8x8xi1>, vector<2x8x8xf32>
    %cst_18 = arith.constant dense<0xFF800000> : vector<2x8xf32>
    %54 = vector.multi_reduction <maximumf>, %53, %cst_18 [2] : vector<2x8x8xf32> to vector<2x8xf32>
    %55 = vector.shape_cast %54 : vector<2x8xf32> to vector<2x8x1xf32>
    %56 = vector.broadcast %55 : vector<2x8x1xf32> to vector<2x8x8xf32>
    %57 = arith.subf %53, %56 : vector<2x8x8xf32>
    %58 = math.exp %57 : vector<2x8x8xf32>
    %cst_19 = arith.constant dense<0.000000e+00> : vector<2x8xf32>
    %59 = vector.multi_reduction <add>, %58, %cst_19 [2] : vector<2x8x8xf32> to vector<2x8xf32>
    %60 = vector.shape_cast %59 : vector<2x8xf32> to vector<2x8x1xf32>
    %61 = tpu.reciprocal %60 {approx = true} : vector<2x8x1xf32> -> vector<2x8x1xf32>
    %62 = vector.broadcast %61 : vector<2x8x1xf32> to vector<2x8x8xf32>
    %63 = arith.mulf %58, %62 : vector<2x8x8xf32>
    %64 = arith.truncf %63 : vector<2x8x8xf32> to vector<2x8x8xbf16>
    "tpu.trace_start"() <{level = 10 : i32, message = "bqk,bke->bqe"}> : () -> ()
    %cst_20 = arith.constant dense<0.000000e+00> : vector<2x8x16xf32>
    %65 = tpu.matmul %64, %48, %cst_20 {dimension_numbers = #tpu.dot_dimension_numbers<[2], [1], [1], [2], [0, 0, 0, 1, 1, 2], [0], [0]>} : vector<2x8x8xbf16>, vector<2x8x16xbf16>, vector<2x8x16xf32> -> vector<2x8x16xf32>
    "tpu.trace_stop"() : () -> ()
    %c16 = arith.constant 16 : index
    %c0_21 = arith.constant 0 : index
    %66 = vector.load %arg3[%c16, %c0_21] : memref<64x16xbf16, #tpu.memory_space<vmem>>, vector<16x16xbf16>
    %67 = vector.shape_cast %65 : vector<2x8x16xf32> to vector<16x16xf32>
    %68 = arith.truncf %67 : vector<16x16xf32> to vector<16x16xbf16>
    %cst_22 = arith.constant dense<0.000000e+00> : vector<16x16xf32>
    %69 = tpu.matmul %68, %66, %cst_22 {dimension_numbers = #tpu.dot_dimension_numbers<[1], [0], [0], [1], [0, 0, 1, 1], [], []>} : vector<16x16xbf16>, vector<16x16xbf16>, vector<16x16xf32> -> vector<16x16xf32>
    %70 = arith.addf %39, %69 : vector<16x16xf32>
    %71 = vector.extract_strided_slice %4 {offsets = [0, 32], sizes = [16, 16], strides = [1, 1]} : vector<16x192xf32> to vector<16x16xf32>
    %72 = vector.shape_cast %71 : vector<16x16xf32> to vector<2x8x16xf32>
    %73 = arith.truncf %72 : vector<2x8x16xf32> to vector<2x8x16xbf16>
    %74 = vector.extract_strided_slice %4 {offsets = [0, 96], sizes = [16, 16], strides = [1, 1]} : vector<16x192xf32> to vector<16x16xf32>
    %75 = vector.shape_cast %74 : vector<16x16xf32> to vector<2x8x16xf32>
    %76 = arith.truncf %75 : vector<2x8x16xf32> to vector<2x8x16xbf16>
    %77 = vector.extract_strided_slice %4 {offsets = [0, 160], sizes = [16, 16], strides = [1, 1]} : vector<16x192xf32> to vector<16x16xf32>
    %78 = vector.shape_cast %77 : vector<16x16xf32> to vector<2x8x16xf32>
    %79 = arith.truncf %78 : vector<2x8x16xf32> to vector<2x8x16xbf16>
    "tpu.trace_start"() <{level = 10 : i32, message = "bqe,bke->bqk"}> : () -> ()
    %cst_23 = arith.constant dense<0.000000e+00> : vector<2x8x8xf32>
    %80 = tpu.matmul %73, %76, %cst_23 {dimension_numbers = #tpu.dot_dimension_numbers<[2], [2], [1], [1], [0, 0, 0, 1, 1, 1], [0], [0]>} : vector<2x8x16xbf16>, vector<2x8x16xbf16>, vector<2x8x8xf32> -> vector<2x8x8xf32>
    %cst_24 = arith.constant -1.000000e+09 : f32
    "tpu.trace_stop"() : () -> ()
    %81 = vector.shape_cast %7 : vector<2x1x8xi1> to vector<2x1x8xi1>
    %82 = vector.broadcast %81 : vector<2x1x8xi1> to vector<2x8x8xi1>
    %83 = vector.broadcast %cst_24 : f32 to vector<2x8x8xf32>
    %84 = arith.select %82, %80, %83 : vector<2x8x8xi1>, vector<2x8x8xf32>
    %cst_25 = arith.constant dense<0xFF800000> : vector<2x8xf32>
    %85 = vector.multi_reduction <maximumf>, %84, %cst_25 [2] : vector<2x8x8xf32> to vector<2x8xf32>
    %86 = vector.shape_cast %85 : vector<2x8xf32> to vector<2x8x1xf32>
    %87 = vector.broadcast %86 : vector<2x8x1xf32> to vector<2x8x8xf32>
    %88 = arith.subf %84, %87 : vector<2x8x8xf32>
    %89 = math.exp %88 : vector<2x8x8xf32>
    %cst_26 = arith.constant dense<0.000000e+00> : vector<2x8xf32>
    %90 = vector.multi_reduction <add>, %89, %cst_26 [2] : vector<2x8x8xf32> to vector<2x8xf32>
    %91 = vector.shape_cast %90 : vector<2x8xf32> to vector<2x8x1xf32>
    %92 = tpu.reciprocal %91 {approx = true} : vector<2x8x1xf32> -> vector<2x8x1xf32>
    %93 = vector.broadcast %92 : vector<2x8x1xf32> to vector<2x8x8xf32>
    %94 = arith.mulf %89, %93 : vector<2x8x8xf32>
    %95 = arith.truncf %94 : vector<2x8x8xf32> to vector<2x8x8xbf16>
    "tpu.trace_start"() <{level = 10 : i32, message = "bqk,bke->bqe"}> : () -> ()
    %cst_27 = arith.constant dense<0.000000e+00> : vector<2x8x16xf32>
    %96 = tpu.matmul %95, %79, %cst_27 {dimension_numbers = #tpu.dot_dimension_numbers<[2], [1], [1], [2], [0, 0, 0, 1, 1, 2], [0], [0]>} : vector<2x8x8xbf16>, vector<2x8x16xbf16>, vector<2x8x16xf32> -> vector<2x8x16xf32>
    "tpu.trace_stop"() : () -> ()
    %c32 = arith.constant 32 : index
    %c0_28 = arith.constant 0 : index
    %97 = vector.load %arg3[%c32, %c0_28] : memref<64x16xbf16, #tpu.memory_space<vmem>>, vector<16x16xbf16>
    %98 = vector.shape_cast %96 : vector<2x8x16xf32> to vector<16x16xf32>
    %99 = arith.truncf %98 : vector<16x16xf32> to vector<16x16xbf16>
    %cst_29 = arith.constant dense<0.000000e+00> : vector<16x16xf32>
    %100 = tpu.matmul %99, %97, %cst_29 {dimension_numbers = #tpu.dot_dimension_numbers<[1], [0], [0], [1], [0, 0, 1, 1], [], []>} : vector<16x16xbf16>, vector<16x16xbf16>, vector<16x16xf32> -> vector<16x16xf32>
    %101 = arith.addf %70, %100 : vector<16x16xf32>
    %102 = vector.extract_strided_slice %4 {offsets = [0, 48], sizes = [16, 16], strides = [1, 1]} : vector<16x192xf32> to vector<16x16xf32>
    %103 = vector.shape_cast %102 : vector<16x16xf32> to vector<2x8x16xf32>
    %104 = arith.truncf %103 : vector<2x8x16xf32> to vector<2x8x16xbf16>
    %105 = vector.extract_strided_slice %4 {offsets = [0, 112], sizes = [16, 16], strides = [1, 1]} : vector<16x192xf32> to vector<16x16xf32>
    %106 = vector.shape_cast %105 : vector<16x16xf32> to vector<2x8x16xf32>
    %107 = arith.truncf %106 : vector<2x8x16xf32> to vector<2x8x16xbf16>
    %108 = vector.extract_strided_slice %4 {offsets = [0, 176], sizes = [16, 16], strides = [1, 1]} : vector<16x192xf32> to vector<16x16xf32>
    %109 = vector.shape_cast %108 : vector<16x16xf32> to vector<2x8x16xf32>
    %110 = arith.truncf %109 : vector<2x8x16xf32> to vector<2x8x16xbf16>
    "tpu.trace_start"() <{level = 10 : i32, message = "bqe,bke->bqk"}> : () -> ()
    %cst_30 = arith.constant dense<0.000000e+00> : vector<2x8x8xf32>
    %111 = tpu.matmul %104, %107, %cst_30 {dimension_numbers = #tpu.dot_dimension_numbers<[2], [2], [1], [1], [0, 0, 0, 1, 1, 1], [0], [0]>} : vector<2x8x16xbf16>, vector<2x8x16xbf16>, vector<2x8x8xf32> -> vector<2x8x8xf32>
    %cst_31 = arith.constant -1.000000e+09 : f32
    "tpu.trace_stop"() : () -> ()
    %112 = vector.shape_cast %7 : vector<2x1x8xi1> to vector<2x1x8xi1>
    %113 = vector.broadcast %112 : vector<2x1x8xi1> to vector<2x8x8xi1>
    %114 = vector.broadcast %cst_31 : f32 to vector<2x8x8xf32>
    %115 = arith.select %113, %111, %114 : vector<2x8x8xi1>, vector<2x8x8xf32>
    %cst_32 = arith.constant dense<0xFF800000> : vector<2x8xf32>
    %116 = vector.multi_reduction <maximumf>, %115, %cst_32 [2] : vector<2x8x8xf32> to vector<2x8xf32>
    %117 = vector.shape_cast %116 : vector<2x8xf32> to vector<2x8x1xf32>
    %118 = vector.broadcast %117 : vector<2x8x1xf32> to vector<2x8x8xf32>
    %119 = arith.subf %115, %118 : vector<2x8x8xf32>
    %120 = math.exp %119 : vector<2x8x8xf32>
    %cst_33 = arith.constant dense<0.000000e+00> : vector<2x8xf32>
    %121 = vector.multi_reduction <add>, %120, %cst_33 [2] : vector<2x8x8xf32> to vector<2x8xf32>
    %122 = vector.shape_cast %121 : vector<2x8xf32> to vector<2x8x1xf32>
    %123 = tpu.reciprocal %122 {approx = true} : vector<2x8x1xf32> -> vector<2x8x1xf32>
    %124 = vector.broadcast %123 : vector<2x8x1xf32> to vector<2x8x8xf32>
    %125 = arith.mulf %120, %124 : vector<2x8x8xf32>
    %126 = arith.truncf %125 : vector<2x8x8xf32> to vector<2x8x8xbf16>
    "tpu.trace_start"() <{level = 10 : i32, message = "bqk,bke->bqe"}> : () -> ()
    %cst_34 = arith.constant dense<0.000000e+00> : vector<2x8x16xf32>
    %127 = tpu.matmul %126, %110, %cst_34 {dimension_numbers = #tpu.dot_dimension_numbers<[2], [1], [1], [2], [0, 0, 0, 1, 1, 2], [0], [0]>} : vector<2x8x8xbf16>, vector<2x8x16xbf16>, vector<2x8x16xf32> -> vector<2x8x16xf32>
    "tpu.trace_stop"() : () -> ()
    %c48 = arith.constant 48 : index
    %c0_35 = arith.constant 0 : index
    %128 = vector.load %arg3[%c48, %c0_35] : memref<64x16xbf16, #tpu.memory_space<vmem>>, vector<16x16xbf16>
    %129 = vector.shape_cast %127 : vector<2x8x16xf32> to vector<16x16xf32>
    %130 = arith.truncf %129 : vector<16x16xf32> to vector<16x16xbf16>
    %cst_36 = arith.constant dense<0.000000e+00> : vector<16x16xf32>
    %131 = tpu.matmul %130, %128, %cst_36 {dimension_numbers = #tpu.dot_dimension_numbers<[1], [0], [0], [1], [0, 0, 1, 1], [], []>} : vector<16x16xbf16>, vector<16x16xbf16>, vector<16x16xf32> -> vector<16x16xf32>
    %132 = arith.addf %101, %131 : vector<16x16xf32>
    %c0_37 = arith.constant 0 : index
    %c0_38 = arith.constant 0 : index
    %133 = vector.load %arg4[%c0_37, %c0_38] : memref<1x16xf32, #tpu.memory_space<vmem>>, vector<1x16xf32>
    %134 = vector.broadcast %133 : vector<1x16xf32> to vector<16x16xf32>
    %135 = arith.addf %132, %134 : vector<16x16xf32>
    %136 = vector.shape_cast %135 : vector<16x16xf32> to vector<2x8x16xf32>
    %c0_39 = arith.constant 0 : index
    %c0_40 = arith.constant 0 : index
    %c0_41 = arith.constant 0 : index
    %137 = vector.load %arg6[%c0_39, %c0_40, %c0_41] : memref<2x8x16xf32, #tpu.memory_space<vmem>>, vector<2x8x16xf32>
    tpu.vector_store %arg6[%c0_39, %c0_40, %c0_41], %136 {strides = array<i32>} : memref<2x8x16xf32, #tpu.memory_space<vmem>>, vector<2x8x16xf32>,
    return
  }
  func.func @transform_0(%arg0: i32) -> (i32, i32, i32) {
    %c0_i32 = arith.constant 0 : i32
    %c0_i32_0 = arith.constant 0 : i32
    %c0_i32_1 = arith.constant 0 : i32
    return %arg0, %c0_i32, %c0_i32_0 : i32, i32, i32
  }
  func.func @transform_1(%arg0: i32) -> (i32, i32) {
    %c0_i32 = arith.constant 0 : i32
    %c0_i32_0 = arith.constant 0 : i32
    %c0_i32_1 = arith.constant 0 : i32
    return %c0_i32, %c0_i32_0 : i32, i32
  }
  func.func @transform_2(%arg0: i32) -> (i32, i32) {
    %c0_i32 = arith.constant 0 : i32
    %c0_i32_0 = arith.constant 0 : i32
    %c0_i32_1 = arith.constant 0 : i32
    return %c0_i32, %c0_i32_0 : i32, i32
  }
  func.func @transform_3(%arg0: i32) -> (i32, i32) {
    %c0_i32 = arith.constant 0 : i32
    %c0_i32_0 = arith.constant 0 : i32
    %c0_i32_1 = arith.constant 0 : i32
    return %c0_i32, %c0_i32_0 : i32, i32
  }
  func.func @transform_4(%arg0: i32) -> (i32, i32, i32) {
    %c0_i32 = arith.constant 0 : i32
    %c0_i32_0 = arith.constant 0 : i32
    %c0_i32_1 = arith.constant 0 : i32
    return %arg0, %c0_i32, %c0_i32_0 : i32, i32, i32
  }
  func.func @transform_5(%arg0: i32) -> (i32, i32, i32) {
    %c0_i32 = arith.constant 0 : i32
    %c0_i32_0 = arith.constant 0 : i32
    %c0_i32_1 = arith.constant 0 : i32
    return %arg0, %c0_i32, %c0_i32_0 : i32, i32, i32
  }
}

</mosaic_0001>

<bundles_post_ra>
// kernel: tpu_custom_call.1
= control target key start
LH: loop header
LB: loop body
LE: loop exit
PB: predicated region body
PF: predicated region fallthrough
CT: control target
= control target key end

     0   :  { %v1497_v2 = vmov 0   ;;  %vm37_vm0 = vcmask 130048   ;;  %s1783_s0 = inlined_call_operand.vmem [shape: f32[2,8,16], index: 0, kind: input, shape index: {}]   ;;  %s1784_s1 = inlined_call_operand.vmem [shape: bf16[16,192], index: 1, kind: input, shape index: {}]   ;;  %s1785_s2 = inlined_call_operand.vmem [shape: bf16[64,16], index: 2, kind: input, shape index: {}]   ;;  %s1786_s3 = inlined_call_operand.vmem [shape: f32[1,16], index: 3, kind: input, shape index: {}]   ;;  %s1787_s4 = inlined_call_operand.vmem [shape: s32[2,1,8], index: 4, kind: input, shape index: {}]   ;;  %s1788_s5 = inlined_call_operand.hbm [shape: f32[2,8,16], index: 5, kind: output, shape index: {}]  }
   0x1   :  { %v1434_v0 = vld [vmem:[%s1784_s1 + $0x4] ss:$8 sps:$4 sm:$0xff]   ;;  %v1436_v1 = vld [vmem:[%s1784_s1] ss:$8 sps:$4 sm:$0xff]   ;;  %73 = vmatprep.mubr.bf16.mxu0 %v1497_v2 }
   0x2   :  { %41 = vmatprep.subr.bf16.mxu0 %v1434_v0  ;;  %v22_v3 = vld [vmem:[%s1783_s0] sm:$0xff]  ;;  %v23_v4 = vld [vmem:[%s1783_s0 + $0x8] sm:$0xff] }
   0x3   :  { %42 = vmatpush1.bf16.msra.mxu0 %v1436_v1  ;;  %v24_v5 = vpack.c.bf16 %v23_v4, %v22_v3 }
   0x4   :  { %10 = vsyncpa [#allocation3], 0  ;;  %v1498_v6 = vmov 0.0   ;;  %vm1499_vm1 = vmmov 0   ;;  %s1500_s0 = smov 64   ;;  %vm232_vm2 = vcmask 1043456   ;;  %v192_v21 = vlaneseq }
   0x5   :  { %1301 = vmatprep.subr.bf16.mxu1 %v1498_v6  ;;  %1307 = vmatprep.subr.bf16.mxu0 %v1498_v6  ;;  %v84_v22 = vld [vmem:[%s1787_s4] sm:$0x1]  ;;  %v85_v24 = vld [vmem:[%s1787_s4 + $0x1] sm:$0x1]  ;;  %vm204_vm6 = vcmask 64512   ;;  %s1501_s4 = smov 48  }
   0x6   :  { %1235 = vmatmul.mubr.msk.bf16.vlgmr.msra.gmra.mrb[0].mxu0 %vm37_vm0, %v24_v5  ;;  %1303 = vmatprep.mubr.msk.bf16.mxu1 %vm1499_vm1, %v1498_v6  ;;  %v193_v23 = vshrl.u32 %v192_v21, 7  ;;  %vm86_vm3 = vcmp.ne.s32.totalorder %v84_v22, 0  ;;  %vm87_vm4 = vcmp.ne.s32.totalorder %v85_v24, 0  ;;  %s1502_s29 = smov 112   ;;  %s1503_s30 = smov 32  }
   0x7   :  { %1309 = vmatprep.mubr.msk.bf16.mxu0 %vm1499_vm1, %v1498_v6  ;;  %v190_v26 = vsel %vm86_vm3, 1, %v1497_v2  ;;  %v191_v28 = vsel %vm87_vm4, 1, %v1497_v2  ;;  %s1504_s6 = smov 96   ;;  %s1505_s11 = smov 16  }
   0x8   :  { %v194_v25 = vsub.s32 0, %v193_v23  ;;  %s1506_s12 = smov 80   ;;  %s1507_s18 = smov [#allocation2]  }
   0x9   :  { %s1222_s19 = sshll.u32 %s1507_s18, 4  ;;  %s1223_s19 = int_to_ptr.vmem [resolvable:$true] %s1222_s19 }
   0xa   :  { %v1593_v27 = vrot.slane %v190_v26, %v194_v25  ;;  %v1596_v29 = vrot.slane %v191_v28, %v194_v25  ;;  %s1473_s20 = scalar_lea.vmem %s1223_s19, 256  ;;  %p1478_p1 = scmp.lt.s32.totalorder %s1223_s19, %s1223_s19 }
   0xb   :  { %p1474_p0 = scmp.ne.s32.totalorder %s1223_s19, %s1473_s20  ;;  %p1479_p2 = scmp.lt.s32.totalorder %s1473_s20, %s1473_s20 }
   0xc   :  { %vm200_vm5 = vcmp.eq.s32.totalorder %v1593_v27, 1  ;;  %vm201_vm7 = vcmp.eq.s32.totalorder %v1596_v29, 1 }
   0xd   :  { %p1480_p3 = por %p1479_p2, %p1478_p1 }
   0xf   :  { %p1481_p4 = pnand %p1480_p3, %p1474_p0 }
  0xd9   :  { %v75_v7 = vpop.f32.mrb[0].mxu0 }
  0xda   :  { %v1559_v8 = vpack.c.bf16 %v75_v7, %v75_v7  ;;  %v77_v9 = vpop.f32.mrb[1].mxu0 }
  0xdb   :  { %v79_v10 = vpop.f32.mrb[2].mxu0  ;;  %v1567_v16 = vpack.c.bf16 %v77_v9, %v77_v9 }
  0xdc   :  { %93 = vrot.lane.b32.xlu0 %v1559_v8, %s1500_s0  ;;  %v81_v11 = vpop.f32.mrb[3].mxu0  ;;  %v1562_v12 = vpack.c.bf16 %v79_v10, %v79_v10 }
  0xdd   :  { %v1571_v18 = vpack.c.bf16 %v81_v11, %v81_v11  ;;  %v234_v19 = vsel %vm232_vm2, %v1567_v16, 0 }
  0xdf   :  { %v280_v20 = vsel %vm232_vm2, %v1571_v18, 0 }
  0xe0   :  { %142 = vrot.lane.b32.xlu0 %v1562_v12, %s1500_s0 }
 0x14e   :  { %v94_v13 = vpop.permute.xlu0 %93 }
 0x14f   :  { %v99_v14 = vsel %vm37_vm0, %v94_v13, 0 }
 0x150   :  { %1302 = vmatpush3.bf16.xpose.msra.mxu1 %v99_v14 }
 0x151   :  { %1313 = vmatprep.subr.bf16.mxu1 %v1498_v6 }
 0x152   :  { %v143_v15 = vpop.permute.xlu0 %142 }
 0x153   :  { %v148_v17 = vsel %vm37_vm0, %v143_v15, 0 }
 0x154   :  { %1308 = vmatpush3.bf16.xpose.msra.mxu0 %v148_v17 }
 0x155   :  { %1319 = vmatprep.subr.bf16.mxu0 %v1498_v6 }
 0x157   :  { %1304 = vmatmul.mubr.msk.bf16.vlgmr.msra.gmra.mrb[0].mxu1 %vm37_vm0, %v1559_v8 }
 0x158   :  { %1314 = vmatpush3.bf16.msra.mxu1 %v234_v19  ;;  %1315 = vmatprep.mubr.msk.bf16.mxu1 %vm1499_vm1, %v1498_v6 }
 0x159   :  { %1325 = vmatprep.subr.bf16.mxu1 %v1498_v6 }
 0x15b   :  { %1310 = vmatmul.mubr.msk.bf16.vlgmr.msra.gmra.mrb[4].mxu0 %vm37_vm0, %v1562_v12 }
 0x15c   :  { %1320 = vmatpush3.bf16.msra.mxu0 %v280_v20  ;;  %1321 = vmatprep.mubr.msk.bf16.mxu0 %vm1499_vm1, %v1498_v6 }
 0x15d   :  { %1331 = vmatprep.subr.bf16.mxu0 %v1498_v6 }
 0x22a   :  { %v135_v30 = vpop.f32.mrb[0].mxu1 }
 0x22b   :  { %v202_v31 = vsel %vm200_vm5, %v135_v30, -1e+09  ;;  %v1305_v32 = vpop.f32.mrb[1].mxu1 }
 0x22c   :  { %v138_v33 = vpop.f32.mrb[2].mxu1  ;;  %v205_v34 = vsel %vm204_vm6, %v202_v31, -inf }
 0x22d   :  { %206 = vmax.xlane.f32.xlu1 %v205_v34  ;;  %v1306_v35 = vpop.f32.mrb[3].mxu1 }
 0x22e   :  { %v184_v36 = vpop.f32.mrb[4].mxu0 }
 0x22f   :  { %v203_v37 = vsel %vm201_vm7, %v184_v36, -1e+09  ;;  %v1311_v38 = vpop.f32.mrb[5].mxu0 }
 0x230   :  { %v187_v39 = vpop.f32.mrb[6].mxu0  ;;  %v208_v40 = vsel %vm204_vm6, %v203_v37, -inf }
 0x231   :  { %209 = vmax.xlane.f32.xlu1 %v208_v40  ;;  %v1312_v41 = vpop.f32.mrb[7].mxu0 }
 0x242   :  { %327 = vrot.lane.b32.xlu1 %v1559_v8, %s1501_s4 }
 0x246   :  { %377 = vrot.lane.b32.xlu1 %v1562_v12, %s1501_s4 }
 0x2ba   :  { %v207_v42 = vpop.xlane.xlu1 %206 }
 0x2bb   :  { %v211_v43 = vsub.f32 %v202_v31, %v207_v42 }
 0x2bd   :  { %v213_v44 = vmul.f32 1.442695, %v211_v43 }
 0x2be   :  { %v210_v45 = vpop.xlane.xlu1 %209 }
 0x2bf   :  { %1441 = vpow2.f32 %v213_v44  ;;  %v212_v46 = vsub.f32 %v203_v37, %v210_v45 }
 0x2c1   :  { %v215_v47 = vmul.f32 1.442695, %v212_v46 }
 0x2c2   :  { %v328_v52 = vpop.permute.xlu1 %327 }
 0x2c3   :  { %1443 = vpow2.f32 %v215_v47  ;;  %v333_v60 = vsel %vm37_vm0, %v328_v52, 0  ;;  %v1437_v52 = vld [vmem:[%s1785_s2] sm:$0xff]  }
 0x2c6   :  { %v378_v53 = vpop.permute.xlu1 %377 }
 0x2c7   :  { %v383_v63 = vsel %vm37_vm0, %v378_v53, 0 }
 0x2c9   :  { %v1442_v48 = vpop.eup %1441 }
 0x2ca   :  { %v217_v49 = vsel %vm204_vm6, %v1442_v48, 0.0 }
 0x2cb   :  { %218 = vadd.xlane.f32.xlu0 %v217_v49 }
 0x2cd   :  { %v1444_v50 = vpop.eup %1443 }
 0x2ce   :  { %v220_v51 = vsel %vm204_vm6, %v1444_v50, 0.0 }
 0x2cf   :  { %221 = vadd.xlane.f32.xlu1 %v220_v51 }
 0x2e0   :  { %325 = vrot.lane.b32.xlu1 %v1559_v8, %s1502_s29 }
 0x2e4   :  { %375 = vrot.lane.b32.xlu1 %v1562_v12, %s1502_s29 }
 0x358   :  { %v219_v54 = vpop.xlane.xlu0 %218 }
 0x359   :  { %1445 = vrcp.f32 %v219_v54 }
 0x35c   :  { %v222_v55 = vpop.xlane.xlu1 %221 }
 0x35d   :  { %1447 = vrcp.f32 %v222_v55 }
 0x360   :  { %v326_v0 = vpop.permute.xlu1 %325 }
 0x363   :  { %v1446_v56 = vpop.eup %1445 }
 0x364   :  { %v225_v57 = vmul.f32 %v1446_v56, %v1442_v48  ;;  %v376_v1 = vpop.permute.xlu1 %375  ;;  %v1438_v48 = vld [vmem:[%s1785_s2 + $0x8] sm:$0xff]  }
 0x366   :  { %v227_v58 = vpack.c.bf16 %v225_v57, %v225_v57 }
 0x367   :  { %v1448_v59 = vpop.eup %1447 }
 0x368   :  { %v226_v61 = vmul.f32 %v1448_v59, %v1444_v50  ;;  %1316 = vmatmul.mubr.msk.bf16.vlgmr.msra.gmra.mrb[4].mxu1 %vm204_vm6, %v227_v58 }
 0x369   :  { %1326 = vmatpush3.bf16.xpose.msra.mxu1 %v333_v60  ;;  %1327 = vmatprep.mubr.msk.bf16.mxu1 %vm1499_vm1, %v1498_v6 }
 0x36a   :  { %v228_v62 = vpack.c.bf16 %v226_v61, %v226_v61  ;;  %1337 = vmatprep.subr.bf16.mxu1 %v1498_v6 }
 0x36c   :  { %1322 = vmatmul.mubr.msk.bf16.vlgmr.msra.gmra.mrb[8].mxu0 %vm204_vm6, %v228_v62 }
 0x36d   :  { %1332 = vmatpush3.bf16.xpose.msra.mxu0 %v383_v63  ;;  %1333 = vmatprep.mubr.msk.bf16.mxu0 %vm1499_vm1, %v1498_v6 }
 0x36e   :  { %1343 = vmatprep.subr.bf16.mxu0 %v1498_v6 }
 0x370   :  { %1328 = vmatmul.mubr.msk.bf16.vlgmr.msra.gmra.mrb[8].mxu1 %vm37_vm0, %v326_v0 }
 0x371   :  { %1339 = vmatprep.mubr.msk.bf16.mxu1 %vm1499_vm1, %v1498_v6 }
 0x374   :  { %1334 = vmatmul.mubr.msk.bf16.vlgmr.msra.gmra.mrb[12].mxu0 %vm37_vm0, %v376_v1 }
 0x375   :  { %1345 = vmatprep.mubr.msk.bf16.mxu0 %vm1499_vm1, %v1498_v6 }
 0x43b   :  { %v1629_v2 = vpop.f32.mrb[4].mxu1 }
 0x43c   :  { %v1317_v3 = vpop.f32.mrb[5].mxu1 }
 0x43d   :  { %v273_v4 = vpop.f32.mrb[6].mxu1 }
 0x43e   :  { %v1318_v5 = vpop.f32.mrb[7].mxu1 }
 0x43f   :  { %v1631_v7 = vpop.f32.mrb[8].mxu0 }
 0x440   :  { %v324_v9 = vpack.c.bf16 %v1631_v7, %v1629_v2  ;;  %v1323_v10 = vpop.f32.mrb[9].mxu0 }
 0x441   :  { %v319_v11 = vpop.f32.mrb[10].mxu0 }
 0x442   :  { %v1324_v13 = vpop.f32.mrb[11].mxu0 }
 0x443   :  { %v369_v14 = vpop.f32.mrb[8].mxu1 }
 0x444   :  { %v425_v15 = vsel %vm200_vm5, %v369_v14, -1e+09  ;;  %v1329_v17 = vpop.f32.mrb[9].mxu1 }
 0x445   :  { %v372_v19 = vpop.f32.mrb[10].mxu1  ;;  %v427_v20 = vsel %vm204_vm6, %v425_v15, -inf }
 0x446   :  { %428 = vmax.xlane.f32.xlu0 %v427_v20  ;;  %v1330_v21 = vpop.f32.mrb[11].mxu1 }
 0x447   :  { %v419_v22 = vpop.f32.mrb[12].mxu0 }
 0x448   :  { %v426_v23 = vsel %vm201_vm7, %v419_v22, -1e+09  ;;  %v1335_v24 = vpop.f32.mrb[13].mxu0 }
 0x449   :  { %v422_v25 = vpop.f32.mrb[14].mxu0  ;;  %v430_v26 = vsel %vm204_vm6, %v426_v23, -inf }
 0x44a   :  { %431 = vmax.xlane.f32.xlu1 %v430_v26  ;;  %v1336_v28 = vpop.f32.mrb[15].mxu0 }
 0x45b   :  { %704 = vrot.lane.b32.xlu1 %v1562_v12, %s1503_s30 }
 0x45c   :  { %452 = vrot.lane.b32.xlu0 %v1567_v16, %s1502_s29 }
 0x4d3   :  { %v429_v30 = vpop.xlane.xlu0 %428 }
 0x4d4   :  { %v433_v31 = vsub.f32 %v425_v15, %v429_v30 }
 0x4d6   :  { %v435_v32 = vmul.f32 1.442695, %v433_v31 }
 0x4d7   :  { %v453_v33 = vpop.permute.xlu0 %452  ;;  %v432_v34 = vpop.xlane.xlu1 %431 }
 0x4d8   :  { %1449 = vpow2.f32 %v435_v32  ;;  %v458_v35 = vsel %vm232_vm2, %v453_v33, 0  ;;  %v434_v36 = vsub.f32 %v426_v23, %v432_v34 }
 0x4d9   :  { %1338 = vmatpush3.bf16.msra.mxu1 %v458_v35 }
 0x4da   :  { %v437_v37 = vmul.f32 1.442695, %v434_v36  ;;  %1349 = vmatprep.subr.bf16.mxu1 %v1498_v6 }
 0x4db   :  { %v705_v55 = vpop.permute.xlu1 %704 }
 0x4dc   :  { %1451 = vpow2.f32 %v437_v37  ;;  %v710_v56 = vsel %vm37_vm0, %v705_v55, 0 }
 0x4e2   :  { %v1450_v38 = vpop.eup %1449 }
 0x4e3   :  { %v439_v39 = vsel %vm204_vm6, %v1450_v38, 0.0 }
 0x4e4   :  { %440 = vadd.xlane.f32.xlu0 %v439_v39 }
 0x4e6   :  { %v1452_v40 = vpop.eup %1451 }
 0x4e7   :  { %v442_v41 = vsel %vm204_vm6, %v1452_v40, 0.0 }
 0x4e8   :  { %443 = vadd.xlane.f32.xlu0 %v442_v41 }
 0x4fe   :  { %501 = vrot.lane.b32.xlu0 %v1571_v18, %s1502_s29 }
 0x502   :  { %654 = vrot.lane.b32.xlu0 %v1559_v8, %s1503_s30 }
 0x506   :  { %652 = vrot.lane.b32.xlu0 %v1559_v8, %s1504_s6 }
 0x50a   :  { %702 = vrot.lane.b32.xlu0 %v1562_v12, %s1504_s6 }
 0x571   :  { %v441_v42 = vpop.xlane.xlu0 %440 }
 0x572   :  { %1453 = vrcp.f32 %v441_v42 }
 0x575   :  { %v444_v43 = vpop.xlane.xlu0 %443 }
 0x576   :  { %1455 = vrcp.f32 %v444_v43 }
 0x579   :  { %v502_v44 = vpop.permute.xlu0 %501 }
 0x57a   :  { %v507_v45 = vsel %vm232_vm2, %v502_v44, 0 }
 0x57b   :  { %1344 = vmatpush3.bf16.msra.mxu0 %v507_v45 }
 0x57c   :  { %v1454_v46 = vpop.eup %1453  ;;  %1355 = vmatprep.subr.bf16.mxu0 %v1498_v6 }
 0x57d   :  { %v447_v47 = vmul.f32 %v1454_v46, %v1450_v38  ;;  %v655_v54 = vpop.permute.xlu0 %654 }
 0x57e   :  { %v660_v3 = vsel %vm37_vm0, %v655_v54, 0 }
 0x57f   :  { %v449_v49 = vpack.c.bf16 %v447_v47, %v447_v47 }
 0x580   :  { %v1456_v50 = vpop.eup %1455 }
 0x581   :  { %v448_v51 = vmul.f32 %v1456_v50, %v1452_v40  ;;  %1340 = vmatmul.mubr.msk.bf16.vlgmr.msra.gmra.mrb[12].mxu1 %vm204_vm6, %v449_v49  ;;  %v653_v57 = vpop.permute.xlu0 %652 }
 0x582   :  { %1350 = vmatpush3.bf16.msra.mxu1 %v1438_v48  ;;  %1351 = vmatprep.mubr.msk.bf16.mxu1 %vm1499_vm1, %v1498_v6 }
 0x583   :  { %v450_v53 = vpack.c.bf16 %v448_v51, %v448_v51  ;;  %1361 = vmatprep.subr.bf16.mxu1 %v1498_v6 }
 0x585   :  { %1346 = vmatmul.mubr.msk.bf16.vlgmr.msra.gmra.mrb[16].mxu0 %vm204_vm6, %v450_v53  ;;  %v703_v58 = vpop.permute.xlu0 %702 }
 0x586   :  { %1356 = vmatpush3.bf16.msra.mxu0 %v1437_v52  ;;  %1357 = vmatprep.mubr.msk.bf16.mxu0 %vm1499_vm1, %v1498_v6 }
 0x587   :  { %1367 = vmatprep.subr.bf16.mxu0 %v1498_v6 }
 0x58d   :  { %1358 = vmatmul.mubr.msk.bf16.vlgmr.msra.gmra.mrb[20].mxu0 %vm37_vm0, %v324_v9 }
 0x58e   :  { %1369 = vmatprep.mubr.msk.bf16.mxu0 %vm1499_vm1, %v1498_v6 }
 0x58f   :  { %1368 = vmatpush3.bf16.xpose.msra.mxu0 %v710_v56 }
 0x590   :  { %1379 = vmatprep.subr.bf16.mxu0 %v1498_v6 }
 0x596   :  { %1370 = vmatmul.mubr.msk.bf16.vlgmr.msra.gmra.mrb[24].mxu0 %vm37_vm0, %v703_v58 }
 0x597   :  { %1381 = vmatprep.mubr.msk.bf16.mxu0 %vm1499_vm1, %v1498_v6 }
 0x654   :  { %v494_v59 = vpop.f32.mrb[12].mxu1 }
 0x655   :  { %v1341_v60 = vpop.f32.mrb[13].mxu1 }
 0x656   :  { %v497_v61 = vpop.f32.mrb[14].mxu1 }
 0x657   :  { %v1342_v62 = vpop.f32.mrb[15].mxu1 }
 0x658   :  { %v543_v63 = vpop.f32.mrb[16].mxu0 }
 0x659   :  { %v551_v0 = vpack.c.bf16 %v543_v63, %v494_v59  ;;  %v1347_v1 = vpop.f32.mrb[17].mxu0 }
 0x65a   :  { %v546_v2 = vpop.f32.mrb[18].mxu0 }
 0x65b   :  { %v1348_v4 = vpop.f32.mrb[19].mxu0  ;;  %1352 = vmatmul.mubr.msk.bf16.vlgmr.msra.gmra.mrb[16].mxu1 %vm37_vm0, %v551_v0 }
 0x65c   :  { %1362 = vmatpush3.bf16.xpose.msra.mxu1 %v660_v3  ;;  %1363 = vmatprep.mubr.msk.bf16.mxu1 %vm1499_vm1, %v1498_v6 }
 0x65d   :  { %1373 = vmatprep.subr.bf16.mxu1 %v1498_v6 }
 0x660   :  { %v645_v5 = vpop.f32.mrb[20].mxu0 }
 0x661   :  { %v1359_v7 = vpop.f32.mrb[21].mxu0 }
 0x662   :  { %v648_v9 = vpop.f32.mrb[22].mxu0 }
 0x663   :  { %v1360_v10 = vpop.f32.mrb[23].mxu0  ;;  %1364 = vmatmul.mubr.msk.bf16.vlgmr.msra.gmra.mrb[20].mxu1 %vm37_vm0, %v653_v57  ;;  %v1439_v57 = vld [vmem:[%s1785_s2 + $0x10] sm:$0xff]  }
 0x664   :  { %1375 = vmatprep.mubr.msk.bf16.mxu1 %vm1499_vm1, %v1498_v6 }
 0x669   :  { %v746_v11 = vpop.f32.mrb[24].mxu0 }
 0x66a   :  { %v753_v13 = vsel %vm201_vm7, %v746_v11, -1e+09  ;;  %v1371_v14 = vpop.f32.mrb[25].mxu0 }
 0x66b   :  { %v749_v15 = vpop.f32.mrb[26].mxu0  ;;  %v757_v17 = vsel %vm204_vm6, %v753_v13, -inf }
 0x66c   :  { %758 = vmax.xlane.f32.xlu1 %v757_v17  ;;  %v1372_v19 = vpop.f32.mrb[27].mxu0 }
 0x67d   :  { %826 = vrot.lane.b32.xlu1 %v1571_v18, %s1504_s6 }
 0x681   :  { %931 = vrot.lane.b32.xlu1 %v1559_v8, %s1505_s11 }
 0x685   :  { %929 = vrot.lane.b32.xlu1 %v1559_v8, %s1506_s12 }
 0x6f9   :  { %v759_v20 = vpop.xlane.xlu1 %758 }
 0x6fa   :  { %v761_v23 = vsub.f32 %v753_v13, %v759_v20 }
 0x6fc   :  { %v764_v24 = vmul.f32 1.442695, %v761_v23 }
 0x6fd   :  { %v827_v21 = vpop.permute.xlu1 %826 }
 0x6fe   :  { %v832_v22 = vsel %vm232_vm2, %v827_v21, 0  ;;  %1457 = vpow2.f32 %v764_v24 }
 0x6ff   :  { %1380 = vmatpush3.bf16.msra.mxu0 %v832_v22 }
 0x700   :  { %1391 = vmatprep.subr.bf16.mxu0 %v1498_v6 }
 0x701   :  { %v932_v48 = vpop.permute.xlu1 %931 }
 0x702   :  { %v937_v50 = vsel %vm37_vm0, %v932_v48, 0 }
 0x705   :  { %v930_v51 = vpop.permute.xlu1 %929 }
 0x708   :  { %v1458_v37 = vpop.eup %1457 }
 0x709   :  { %v769_v39 = vsel %vm204_vm6, %v1458_v37, 0.0 }
 0x72e   :  { %v595_v25 = vpop.f32.mrb[16].mxu1 }
 0x72f   :  { %v1701_v26 = vadd.f32 %v645_v5, %v595_v25  ;;  %v1353_v28 = vpop.f32.mrb[17].mxu1 }
 0x730   :  { %v598_v30 = vpop.f32.mrb[18].mxu1 }
 0x731   :  { %v1703_v31 = vadd.f32 %v648_v9, %v598_v30  ;;  %v1354_v32 = vpop.f32.mrb[19].mxu1 }
 0x736   :  { %v696_v33 = vpop.f32.mrb[20].mxu1 }
 0x737   :  { %v752_v8 = vsel %vm200_vm5, %v696_v33, -1e+09  ;;  %v1365_v34 = vpop.f32.mrb[21].mxu1 }
 0x738   :  { %v699_v35 = vpop.f32.mrb[22].mxu1  ;;  %v754_v36 = vsel %vm204_vm6, %v752_v8, -inf }
 0x739   :  { %755 = vmax.xlane.f32.xlu0 %v754_v36  ;;  %v1366_v38 = vpop.f32.mrb[23].mxu1 }
 0x73d   :  { %770 = vadd.xlane.f32.xlu0 %v769_v39 }
 0x7c6   :  { %v756_v40 = vpop.xlane.xlu0 %755 }
 0x7c7   :  { %v760_v41 = vsub.f32 %v752_v8, %v756_v40 }
 0x7c9   :  { %v762_v42 = vmul.f32 1.442695, %v760_v41 }
 0x7ca   :  { %v771_v43 = vpop.xlane.xlu0 %770 }
 0x7cb   :  { %1459 = vpow2.f32 %v762_v42 }
 0x7cc   :  { %1461 = vrcp.f32 %v771_v43 }
 0x7d5   :  { %v1460_v44 = vpop.eup %1459 }
 0x7d6   :  { %v1462_v45 = vpop.eup %1461  ;;  %v766_v46 = vsel %vm204_vm6, %v1460_v44, 0.0 }
 0x7d7   :  { %v775_v47 = vmul.f32 %v1462_v45, %v1458_v37  ;;  %767 = vadd.xlane.f32.xlu0 %v766_v46 }
 0x7d9   :  { %v777_v49 = vpack.c.bf16 %v775_v47, %v775_v47 }
 0x7db   :  { %1382 = vmatmul.mubr.msk.bf16.vlgmr.msra.gmra.mrb[28].mxu0 %vm204_vm6, %v777_v49 }
 0x7dc   :  { %1392 = vmatpush3.bf16.xpose.msra.mxu0 %v937_v50  ;;  %1393 = vmatprep.mubr.msk.bf16.mxu0 %vm1499_vm1, %v1498_v6 }
 0x7dd   :  { %1403 = vmatprep.subr.bf16.mxu0 %v1498_v6 }
 0x7e3   :  { %1394 = vmatmul.mubr.msk.bf16.vlgmr.msra.gmra.mrb[32].mxu0 %vm37_vm0, %v930_v51 }
 0x7e4   :  { %1405 = vmatprep.mubr.msk.bf16.mxu0 %vm1499_vm1, %v1498_v6 }
 0x7ed   :  { %778 = vrot.lane.b32.xlu0 %v1567_v16, %s1504_s6 }
 0x7f1   :  { %981 = vrot.lane.b32.xlu0 %v1562_v12, %s1505_s11 }
 0x7f5   :  { %979 = vrot.lane.b32.xlu0 %v1562_v12, %s1506_s12 }
 0x864   :  { %v768_v52 = vpop.xlane.xlu0 %767 }
 0x865   :  { %1463 = vrcp.f32 %v768_v52 }
 0x868   :  { %v779_v53 = vpop.permute.xlu0 %778 }
 0x869   :  { %v784_v54 = vsel %vm232_vm2, %v779_v53, 0 }
 0x86a   :  { %1374 = vmatpush3.bf16.msra.mxu1 %v784_v54 }
 0x86b   :  { %1385 = vmatprep.subr.bf16.mxu1 %v1498_v6 }
 0x86c   :  { %v982_v4 = vpop.permute.xlu0 %981 }
 0x86d   :  { %v987_v11 = vsel %vm37_vm0, %v982_v4, 0 }
 0x86f   :  { %v1464_v55 = vpop.eup %1463 }
 0x870   :  { %v774_v56 = vmul.f32 %v1464_v55, %v1460_v44  ;;  %v980_v27 = vpop.permute.xlu0 %979 }
 0x872   :  { %v776_v58 = vpack.c.bf16 %v774_v56, %v774_v56 }
 0x874   :  { %1376 = vmatmul.mubr.msk.bf16.vlgmr.msra.gmra.mrb[24].mxu1 %vm204_vm6, %v776_v58  ;;  %v1260_v58 = vld [vmem:[%s1786_s3] ss:$0 sm:$0xff] }
 0x875   :  { %1386 = vmatpush3.bf16.msra.mxu1 %v1439_v57  ;;  %1387 = vmatprep.mubr.msk.bf16.mxu1 %vm1499_vm1, %v1498_v6 }
 0x876   :  { %1397 = vmatprep.subr.bf16.mxu1 %v1498_v6 }
 0x8ae   :  { %v868_v12 = vpop.f32.mrb[28].mxu0 }
 0x8af   :  { %v1383_v59 = vpop.f32.mrb[29].mxu0 }
 0x8b0   :  { %v871_v60 = vpop.f32.mrb[30].mxu0 }
 0x8b1   :  { %v1384_v61 = vpop.f32.mrb[31].mxu0 }
 0x8b6   :  { %v973_v62 = vpop.f32.mrb[32].mxu0 }
 0x8b7   :  { %v1029_v63 = vsel %vm200_vm5, %v973_v62, -1e+09  ;;  %v1395_v0 = vpop.f32.mrb[33].mxu0 }
 0x8b8   :  { %v976_v1 = vpop.f32.mrb[34].mxu0  ;;  %v1031_v2 = vsel %vm204_vm6, %v1029_v63, -inf }
 0x8b9   :  { %1032 = vmax.xlane.f32.xlu1 %v1031_v2  ;;  %v1396_v3 = vpop.f32.mrb[35].mxu0 }
 0x946   :  { %v1033_v14 = vpop.xlane.xlu1 %1032 }
 0x947   :  { %v820_v5 = vpop.f32.mrb[24].mxu1  ;;  %v1037_v15 = vsub.f32 %v1029_v63, %v1033_v14 }
 0x948   :  { %v876_v7 = vpack.c.bf16 %v868_v12, %v820_v5  ;;  %v1377_v9 = vpop.f32.mrb[25].mxu1 }
 0x949   :  { %v823_v10 = vpop.f32.mrb[26].mxu1  ;;  %v1039_v17 = vmul.f32 1.442695, %v1037_v15 }
 0x94a   :  { %v1378_v13 = vpop.f32.mrb[27].mxu1  ;;  %1388 = vmatmul.mubr.msk.bf16.vlgmr.msra.gmra.mrb[28].mxu1 %vm37_vm0, %v876_v7 }
 0x94b   :  { %1398 = vmatpush3.bf16.xpose.msra.mxu1 %v987_v11  ;;  %1399 = vmatprep.mubr.msk.bf16.mxu1 %vm1499_vm1, %v1498_v6  ;;  %1465 = vpow2.f32 %v1039_v17 }
 0x94c   :  { %1409 = vmatprep.subr.bf16.mxu1 %v1498_v6 }
 0x952   :  { %1400 = vmatmul.mubr.msk.bf16.vlgmr.msra.gmra.mrb[32].mxu1 %vm37_vm0, %v980_v27 }
 0x953   :  { %1411 = vmatprep.mubr.msk.bf16.mxu1 %vm1499_vm1, %v1498_v6 }
 0x955   :  { %v1466_v8 = vpop.eup %1465 }
 0x956   :  { %v1043_v35 = vsel %vm204_vm6, %v1466_v8, 0.0 }
 0xa1d   :  { %v920_v19 = vpop.f32.mrb[28].mxu1 }
 0xa1e   :  { %v927_v20 = vadd.f32 %v920_v19, %v1701_v26  ;;  %v1389_v21 = vpop.f32.mrb[29].mxu1 }
 0xa1f   :  { %v923_v22 = vpop.f32.mrb[30].mxu1 }
 0xa20   :  { %v928_v23 = vadd.f32 %v923_v22, %v1703_v31  ;;  %v1390_v24 = vpop.f32.mrb[31].mxu1 }
 0xa25   :  { %v1023_v25 = vpop.f32.mrb[32].mxu1 }
 0xa26   :  { %v1030_v28 = vsel %vm201_vm7, %v1023_v25, -1e+09  ;;  %v1401_v30 = vpop.f32.mrb[33].mxu1 }
 0xa27   :  { %v1026_v32 = vpop.f32.mrb[34].mxu1  ;;  %v1034_v33 = vsel %vm204_vm6, %v1030_v28, -inf }
 0xa28   :  { %1035 = vmax.xlane.f32.xlu0 %v1034_v33  ;;  %v1402_v34 = vpop.f32.mrb[35].mxu1 }
 0xa2c   :  { %1044 = vadd.xlane.f32.xlu0 %v1043_v35 }
 0xa42   :  { %1055 = vrot.lane.b32.xlu0 %v1567_v16, %s1506_s12  ;;  %v1440_v16 = vld [vmem:[%s1785_s2 + $0x18] sm:$0xff]  }
 0xab5   :  { %v1036_v26 = vpop.xlane.xlu0 %1035 }
 0xab6   :  { %v1038_v31 = vsub.f32 %v1030_v28, %v1036_v26 }
 0xab8   :  { %v1041_v36 = vmul.f32 1.442695, %v1038_v31 }
 0xab9   :  { %v1045_v37 = vpop.xlane.xlu0 %1044 }
 0xaba   :  { %1467 = vpow2.f32 %v1041_v36 }
 0xabb   :  { %1469 = vrcp.f32 %v1045_v37 }
 0xabd   :  { %v1056_v29 = vpop.permute.xlu0 %1055 }
 0xabe   :  { %v1061_v38 = vsel %vm232_vm2, %v1056_v29, 0 }
 0xabf   :  { %1404 = vmatpush3.bf16.msra.mxu0 %v1061_v38 }
 0xac0   :  { %1415 = vmatprep.subr.bf16.mxu0 %v1498_v6 }
 0xac4   :  { %v1468_v39 = vpop.eup %1467 }
 0xac5   :  { %v1470_v40 = vpop.eup %1469  ;;  %v1046_v41 = vsel %vm204_vm6, %v1468_v39, 0.0 }
 0xac6   :  { %v1051_v42 = vmul.f32 %v1470_v40, %v1466_v8  ;;  %1047 = vadd.xlane.f32.xlu1 %v1046_v41 }
 0xac8   :  { %v1053_v43 = vpack.c.bf16 %v1051_v42, %v1051_v42 }
 0xaca   :  { %1406 = vmatmul.mubr.msk.bf16.vlgmr.msra.gmra.mrb[36].mxu0 %vm204_vm6, %v1053_v43 }
 0xacb   :  { %1417 = vmatprep.mubr.msk.bf16.mxu0 %vm1499_vm1, %v1498_v6  ;;  %1416 = vmatpush3.bf16.msra.mxu0 %v1440_v16 }
 0xad7   :  { %1103 = vrot.lane.b32.xlu1 %v1571_v18, %s1506_s12 }
 0xb53   :  { %v1048_v44 = vpop.xlane.xlu1 %1047 }
 0xb54   :  { %1471 = vrcp.f32 %v1048_v44 }
 0xb57   :  { %v1104_v45 = vpop.permute.xlu1 %1103 }
 0xb58   :  { %v1109_v46 = vsel %vm232_vm2, %v1104_v45, 0 }
 0xb59   :  { %1410 = vmatpush3.bf16.msra.mxu1 %v1109_v46 }
 0xb5e   :  { %v1472_v47 = vpop.eup %1471 }
 0xb5f   :  { %v1052_v48 = vmul.f32 %v1472_v47, %v1468_v39 }
 0xb61   :  { %v1054_v49 = vpack.c.bf16 %v1052_v48, %v1052_v48 }
 0xb63   :  { %1412 = vmatmul.mubr.msk.bf16.vlgmr.msra.gmra.mrb[36].mxu1 %vm204_vm6, %v1054_v49 }
 0xb9d   :  { %v1097_v6 = vpop.f32.mrb[36].mxu0 }
 0xb9e   :  { %v1407_v50 = vpop.f32.mrb[37].mxu0 }
 0xb9f   :  { %v1100_v51 = vpop.f32.mrb[38].mxu0 }
 0xba0   :  { %v1408_v18 = vpop.f32.mrb[39].mxu0 }
 0xc36   :  { %v1145_v52 = vpop.f32.mrb[36].mxu1 }
 0xc37   :  { %v1153_v53 = vpack.c.bf16 %v1145_v52, %v1097_v6  ;;  %v1413_v54 = vpop.f32.mrb[37].mxu1 }
 0xc38   :  { %v1148_v55 = vpop.f32.mrb[38].mxu1 }
 0xc39   :  { %v1414_v56 = vpop.f32.mrb[39].mxu1  ;;  %1418 = vmatmul.mubr.msk.bf16.vlgmr.msra.gmra.mrb[40].mxu0 %vm37_vm0, %v1153_v53 }
 0xd0c   :  { %v1197_v57 = vpop.f32.mrb[40].mxu0 }
 0xd0d   :  { %v1204_v12 = vadd.f32 %v1197_v57, %v927_v20  ;;  %v1419_v59 = vpop.f32.mrb[41].mxu0 }
 0xd0e   :  { %v1200_v60 = vpop.f32.mrb[42].mxu0 }
 0xd0f   :  { %v1213_v61 = vadd.f32 %v1260_v58, %v1204_v12  ;;  %v1205_v62 = vadd.f32 %v1200_v60, %v928_v23  ;;  %v1420_v63 = vpop.f32.mrb[43].mxu0 }
 0xd11   :  { %1215 = vst.msk [vmem:[#allocation2] sm:$0xff] %vm37_vm0, %v1213_v61  ;;  %v1214_v0 = vadd.f32 %v1260_v58, %v1205_v62 }
 0xd13   :  { %1216 = vst.msk [vmem:[#allocation2 + $0x8] sm:$0xff] %vm37_vm0, %v1214_v0 }
 0xd14   :  { %1484 = shalt.err (!%p1481_p4)
}
 0xd15   :  { %s1485_s22 = scalar_lea.hbm %s1788_s5, 256 }
 0xd16   :  { %p1486_p5 = scmp.ne.s32.totalorder %s1788_s5, %s1485_s22  ;;  %p1489_p6 = scmp.lt.u32.totalorder %s1485_s22, %s1788_s5 }
 0xd18   :  { %p1491_p7 = pnand %p1489_p6, %p1486_p5 }
 0xd1a   :  { %1494 = shalt.err (!%p1491_p7)
}
 0xd1b   :  { %s1508_s1 = smov 128   ;;  %s1509_s26 = smov 8  }
 0xd1c   :  { %1228 = dma.vmem_to_hbm [thread:$0]  %s1223_s19, 256, %s1788_s5, [#allocation3], %s1508_s1, %s1508_s1, %s1509_s26  }
 0xd1d   :  { %1495 = dma.done.wait [#allocation3], 256  }
 0xd1e   :  { %1496 = vsyncadd [#allocation3], 4294967040 }
 0xd1f   :  { %1232 = vsyncpa [#allocation3], 1 }

</bundles_post_ra>
